<compile_context>
chip_gen: v6e
topology: v6e:2x2x1
jax: 0.10.0
libtpu: 0.0.40
codegen_flags: <defaults>
</compile_context>

<pallas_src>
import functools

import jax
import jax.numpy as jnp
from jax import lax
from jax.experimental import pallas as pl
from jax.experimental.pallas import tpu as pltpu


def cbam_kernel(x_ref,
                w1_ref, b1_ref,      # fused layer-1:  (C, 2Cr), (1, 2Cr)
                w2_ref, b2_ref,      # fused (block-diag) layer-2: (3Cr, 2C), (1, 2C)
                wf_ref, bf_ref,      # final conv: (Cout, C) matmul dtype, (Cout, 1) f32
                o_ref,
                gate_ref,            # VMEM scratch (C, b_blk) f32
                *, b_blk, c, cr):
    x = x_ref[...]                                     # (B, C, HW) f32

    # ---- pooling over spatial (lane) axis ----
    mean_c = jnp.mean(x, axis=2)                       # (B, C)
    max_c = jnp.max(x, axis=2)                         # (B, C)

    # ---- fused attention layer 1: one matmul for {spatial, channel-avg, channel-max}
    pooled = jnp.concatenate([mean_c, max_c], axis=0)  # (2B, C)
    h1 = jnp.dot(pooled, w1_ref[...],
                 preferred_element_type=jnp.float32) + b1_ref[...]
    h1 = jnp.maximum(h1, 0.0)                          # (2B, 2Cr)
    # rows :B (mean path) = [h_sp | a],  rows B: (max path) = [unused | m]

    # ---- fused attention layer 2: one block-diagonal matmul + one sigmoid ----
    h2_in = jnp.concatenate([h1[:b_blk], h1[b_blk:, cr:]], axis=1)   # (B, 3Cr) = [h_sp|a|m]
    h2 = jax.nn.sigmoid(
        jnp.dot(h2_in, w2_ref[...], preferred_element_type=jnp.float32)
        + b2_ref[...])                                 # (B, 2C) = [w_sp | w_ch]
    gate = h2[:, :c] + h2[:, c:]                       # (B, C)  = w_sp + w_ch
    gate_ref[...] = gate.T                             # stage transposed: (C, B)

    # ---- per-sample: pre_b = x_b^2 * gate_b ; out_b = Wf @ pre_b + bf ----
    wf = wf_ref[...]                                   # (Cout, C), matmul dtype
    bf = bf_ref[...]                                   # (Cout, 1) f32
    cdt = wf.dtype

    def body(b, carry):
        xb = x_ref[b]                                  # (C, HW) f32
        g = gate_ref[:, pl.ds(b, 1)]                   # (C, 1)  f32
        pre = (xb * xb) * g                            # (C, HW) f32 (VPU)
        acc = jnp.dot(wf, pre.astype(cdt),
                      preferred_element_type=jnp.float32)   # (Cout, HW) MXU
        o_ref[b] = (acc + bf).astype(o_ref.dtype)
        return carry

    lax.fori_loop(0, b_blk, body, 0, unroll=min(b_blk, 4))


def _full_spec(arr):
    nd = arr.ndim
    return pl.BlockSpec(arr.shape, lambda n, _nd=nd: (0,) * _nd)


def _num_tensorcores():
    """Best-effort TensorCore count per device (v7x / megacore have 2)."""
    try:
        kind = jax.devices()[0].device_kind.lower()
    except Exception:
        return 1
    for tag in ("v7", "v5p", "v4"):
        if tag in kind:
            return 2
    return 1


def _pick_block_batch(n, in_bytes, out_bytes, *, num_cores=1,
                      target_block_bytes=2 << 20,
                      pipeline_vmem_budget=20 << 20,
                      min_block_bytes=512 << 10,
                      max_blk=64):
    """Batch samples per grid step.  Target ~2 MiB input blocks (near-full HBM BW),
    keep double-buffered in+out under the VMEM budget, give every TensorCore work,
    and only add extra steps (for DMA/compute overlap) when blocks stay >=512 KiB."""
    b = max(1, min(n, max_blk, target_block_bytes // max(in_bytes, 1)))
    while b > 1 and 2 * b * (in_bytes + out_bytes) > pipeline_vmem_budget:
        b -= 1
    # Multi-TensorCore parts: always worth >= num_cores grid steps.
    if num_cores > 1 and n >= num_cores:
        b = min(b, -(-n // num_cores))
    # Pipelining: prefer >= 2 steps per core, but not at the cost of tiny blocks.
    steps = 2 * max(num_cores, 1)
    if -(-n // b) < steps and (n // steps) * in_bytes >= min_block_bytes:
        b = max(1, -(-n // steps))
    return max(1, b)


def cbam_forward(x_nchw, params, *, matmul_dtype=jnp.bfloat16, block_batch=None,
                 num_cores=None, out_dtype=None):
    """x_nchw: (N, C, H, W) float32 (PyTorch layout).  Returns (N, Cout, H, W)."""
    N, C, H, W = x_nchw.shape
    HW = H * W
    (w1s, b1s, w2s, b2s, w1c, b1c, w2c, b2c, wf, bf) = params
    Cout = wf.shape[0]
    Cr = w1s.shape[0]

    # Build fused / kernel-layout weights once (tiny, outside the kernel).
    w1_f = jnp.concatenate([w1s.T, w1c.T], axis=1)          # (C, 2Cr)
    b1_f = jnp.concatenate([b1s, b1c]).reshape(1, 2 * Cr)
    w2_f = jnp.zeros((3 * Cr, 2 * C), jnp.float32)          # block-diag layer-2
    w2_f = w2_f.at[:Cr, :C].set(w2s.T)                      # spatial block
    w2_f = w2_f.at[Cr:, C:].set(w2c.T)                      # channel block
    b2_f = jnp.concatenate([b2s, b2c]).reshape(1, 2 * C)
    wf_k = wf.astype(matmul_dtype)                          # (Cout, C) matmul dtype
    bf_r = bf.reshape(Cout, 1)

    # NCHW -> (N, C, HW): pure reshape, no HBM transpose round-trip.
    x = x_nchw.reshape(N, C, HW)
    out_dtype = x.dtype if out_dtype is None else out_dtype

    in_bytes = C * HW * x.dtype.itemsize
    out_bytes = Cout * HW * jnp.dtype(out_dtype).itemsize
    cores = _num_tensorcores() if num_cores is None else num_cores
    b_blk = (block_batch if block_batch is not None
             else _pick_block_batch(N, in_bytes, out_bytes, num_cores=cores))

    kern = functools.partial(cbam_kernel, b_blk=b_blk, c=C, cr=Cr)

    out = pl.pallas_call(
        kern,
        out_shape=jax.ShapeDtypeStruct((N, Cout, HW), out_dtype),
        grid_spec=pltpu.PrefetchScalarGridSpec(
            num_scalar_prefetch=0,
            grid=(pl.cdiv(N, b_blk),),
            in_specs=[
                pl.BlockSpec((b_blk, C, HW), lambda n: (n, 0, 0)),
                _full_spec(w1_f), _full_spec(b1_f),
                _full_spec(w2_f), _full_spec(b2_f),
                _full_spec(wf_k), _full_spec(bf_r),
            ],
            out_specs=pl.BlockSpec((b_blk, Cout, HW), lambda n: (n, 0, 0)),
            scratch_shapes=[pltpu.VMEM((C, b_blk), jnp.float32)],
        ),
        compiler_params=pltpu.CompilerParams(
            dimension_semantics=("parallel",),
            vmem_limit_bytes=32 * 1024 * 1024),
    )(x, w1_f, b1_f, w2_f, b2_f, wf_k, bf_r)

    # (N, Cout, HW) -> NCHW: pure reshape.
    return out.reshape(N, Cout, H, W)


def cbam_reference(x_nchw, params):
    """Pure-JAX reference mirroring the PyTorch forward exactly (f32, NCHW)."""
    (w1s, b1s, w2s, b2s, w1c, b1c, w2c, b2c, wf, bf) = params
    N, C, H, W = x_nchw.shape
    xf = x_nchw.reshape(N, C, H * W)

    mean_c = jnp.mean(xf, axis=2)                      # (N, C)
    max_c = jnp.max(xf, axis=2)

    # SpatialAttention
    h = jnp.maximum(mean_c @ w1s.T + b1s, 0.0)
    w_sp = jax.nn.sigmoid(h @ w2s.T + b2s)             # (N, C)

    # ChannelAttention
    a = jnp.maximum(mean_c @ w1c.T + b1c, 0.0)
    m = jnp.maximum(max_c @ w1c.T + b1c, 0.0)
    w_ch = jax.nn.sigmoid(jnp.concatenate([a, m], axis=1) @ w2c.T + b2c)

    x_sp = xf * w_sp[:, :, None]
    x_ch = xf * w_ch[:, :, None]
    pre = xf * (x_sp + x_ch)
    out = jnp.einsum('ncl,oc->nol', pre, wf) + bf[None, :, None]
    return out.reshape(N, -1, H, W)


def init_params(key, C, Cout, r=16):
    """Parameters in PyTorch conv layouts: weight (Cout, Cin), bias (Cout,)."""
    Cr = C // r
    ks = jax.random.split(key, 10)
    s = 0.1
    w1s = s * jax.random.normal(ks[0], (Cr, C), jnp.float32)
    b1s = s * jax.random.normal(ks[1], (Cr,), jnp.float32)
    w2s = s * jax.random.normal(ks[2], (C, Cr), jnp.float32)
    b2s = s * jax.random.normal(ks[3], (C,), jnp.float32)
    w1c = s * jax.random.normal(ks[4], (Cr, C), jnp.float32)
    b1c = s * jax.random.normal(ks[5], (Cr,), jnp.float32)
    w2c = s * jax.random.normal(ks[6], (C, 2 * Cr), jnp.float32)
    b2c = s * jax.random.normal(ks[7], (C,), jnp.float32)
    wf = s * jax.random.normal(ks[8], (Cout, C), jnp.float32)
    bf = s * jax.random.normal(ks[9], (Cout,), jnp.float32)
    return (w1s, b1s, w2s, b2s, w1c, b1c, w2c, b2c, wf, bf)


if __name__ == "__main__":
    # Small shapes: batch=2, channels=32 (so C // 16 = 2), spatial 16x16 (HW=256).
    N, C, H, W = 2, 32, 16, 16
    Cout = C

    key = jax.random.PRNGKey(0)
    kx, kp = jax.random.split(key)
    x = jax.random.normal(kx, (N, C, H, W), jnp.float32)
    params = init_params(kp, C, Cout, r=16)

    ref = jax.block_until_ready(cbam_reference(x, params))

    # Exact-precision path (f32 matmuls) — tight check against the reference.
    out_f32 = jax.block_until_ready(
        cbam_forward(x, params, matmul_dtype=jnp.float32))
    assert out_f32.shape == (N, Cout, H, W), out_f32.shape
    assert jnp.allclose(out_f32, ref, atol=1e-4, rtol=1e-4), (
        float(jnp.max(jnp.abs(out_f32 - ref))))

    # Default fast path (bf16 final-matmul operands, f32 accumulation).
    out_bf16 = jax.block_until_ready(cbam_forward(x, params))
    assert out_bf16.shape == (N, Cout, H, W), out_bf16.shape
    assert jnp.allclose(out_bf16, ref, atol=5e-2, rtol=5e-2), (
        float(jnp.max(jnp.abs(out_bf16 - ref))))

    print("KERNEL_OK")
</pallas_src>

<mosaic_0001>
module attributes {stable_mosaic.version = 11 : i64} {
  func.func @cbam_kernel(%arg0: i32, %arg1: memref<2x32x256xf32, #tpu.memory_space<vmem>>, %arg2: memref<32x4xf32, #tpu.memory_space<vmem>>, %arg3: memref<1x4xf32, #tpu.memory_space<vmem>>, %arg4: memref<6x64xf32, #tpu.memory_space<vmem>>, %arg5: memref<1x64xf32, #tpu.memory_space<vmem>>, %arg6: memref<32x32xf32, #tpu.memory_space<vmem>>, %arg7: memref<32x1xf32, #tpu.memory_space<vmem>>, %arg8: memref<2x32x256xf32, #tpu.memory_space<vmem>>, %arg9: memref<32x2xf32, #tpu.memory_space<vmem>>) attributes {dimension_semantics = [#tpu.dimension_semantics<parallel>], iteration_bounds = array<i64: 1>, scalar_prefetch = 0 : i64, scratch_operands = 1 : i64, tpu.core_type = #tpu.core_type<tc>, window_params = [{transform_indices = @transform_0, window_bounds = array<i64: 2, 32, 256>}, {pipeline_mode = #tpu.pipeline_mode<synchronous>, transform_indices = @transform_1, window_bounds = array<i64: 32, 4>}, {pipeline_mode = #tpu.pipeline_mode<synchronous>, transform_indices = @transform_2, window_bounds = array<i64: 1, 4>}, {pipeline_mode = #tpu.pipeline_mode<synchronous>, transform_indices = @transform_3, window_bounds = array<i64: 6, 64>}, {pipeline_mode = #tpu.pipeline_mode<synchronous>, transform_indices = @transform_4, window_bounds = array<i64: 1, 64>}, {pipeline_mode = #tpu.pipeline_mode<synchronous>, transform_indices = @transform_5, window_bounds = array<i64: 32, 32>}, {pipeline_mode = #tpu.pipeline_mode<synchronous>, transform_indices = @transform_6, window_bounds = array<i64: 32, 1>}, {transform_indices = @transform_7, window_bounds = array<i64: 2, 32, 256>}]} {
    %c0 = arith.constant 0 : index
    %c0_0 = arith.constant 0 : index
    %c0_1 = arith.constant 0 : index
    %0 = vector.load %arg1[%c0, %c0_0, %c0_1] : memref<2x32x256xf32, #tpu.memory_space<vmem>>, vector<2x32x256xf32>
    %cst = arith.constant dense<0.000000e+00> : vector<2x32xf32>
    %1 = vector.multi_reduction <add>, %0, %cst [2] : vector<2x32x256xf32> to vector<2x32xf32>
    %cst_2 = arith.constant 2.560000e+02 : f32
    %2 = vector.broadcast %cst_2 : f32 to vector<2x32xf32>
    %3 = arith.divf %1, %2 : vector<2x32xf32>
    %cst_3 = arith.constant dense<0xFF800000> : vector<2x32xf32>
    %4 = vector.multi_reduction <maximumf>, %0, %cst_3 [2] : vector<2x32x256xf32> to vector<2x32xf32>
    %5 = tpu.concatenate %3, %4 in 0 : vector<2x32xf32>, vector<2x32xf32> -> vector<4x32xf32>
    %c0_4 = arith.constant 0 : index
    %c0_5 = arith.constant 0 : index
    %6 = vector.load %arg2[%c0_4, %c0_5] : memref<32x4xf32, #tpu.memory_space<vmem>>, vector<32x4xf32>
    %cst_6 = arith.constant dense<0.000000e+00> : vector<4x4xf32>
    %7 = tpu.matmul %5, %6, %cst_6 {dimension_numbers = #tpu.dot_dimension_numbers<[1], [0], [0], [1], [0, 0, 1, 1], [], []>} : vector<4x32xf32>, vector<32x4xf32>, vector<4x4xf32> -> vector<4x4xf32>
    %c0_7 = arith.constant 0 : index
    %c0_8 = arith.constant 0 : index
    %8 = vector.load %arg3[%c0_7, %c0_8] : memref<1x4xf32, #tpu.memory_space<vmem>>, vector<1x4xf32>
    %9 = vector.broadcast %8 : vector<1x4xf32> to vector<4x4xf32>
    %10 = arith.addf %7, %9 : vector<4x4xf32>
    %cst_9 = arith.constant 0.000000e+00 : f32
    %11 = vector.broadcast %cst_9 : f32 to vector<4x4xf32>
    %12 = arith.maximumf %10, %11 : vector<4x4xf32>
    %13 = vector.extract_strided_slice %12 {offsets = [0, 0], sizes = [2, 4], strides = [1, 1]} : vector<4x4xf32> to vector<2x4xf32>
    %14 = vector.extract_strided_slice %12 {offsets = [2, 2], sizes = [2, 2], strides = [1, 1]} : vector<4x4xf32> to vector<2x2xf32>
    %15 = tpu.concatenate %13, %14 in 1 : vector<2x4xf32>, vector<2x2xf32> -> vector<2x6xf32>
    %c0_10 = arith.constant 0 : index
    %c0_11 = arith.constant 0 : index
    %16 = vector.load %arg4[%c0_10, %c0_11] : memref<6x64xf32, #tpu.memory_space<vmem>>, vector<6x64xf32>
    %cst_12 = arith.constant dense<0.000000e+00> : vector<2x64xf32>
    %17 = tpu.matmul %15, %16, %cst_12 {dimension_numbers = #tpu.dot_dimension_numbers<[1], [0], [0], [1], [0, 0, 1, 1], [], []>} : vector<2x6xf32>, vector<6x64xf32>, vector<2x64xf32> -> vector<2x64xf32>
    %c0_13 = arith.constant 0 : index
    %c0_14 = arith.constant 0 : index
    %18 = vector.load %arg5[%c0_13, %c0_14] : memref<1x64xf32, #tpu.memory_space<vmem>>, vector<1x64xf32>
    %19 = vector.broadcast %18 : vector<1x64xf32> to vector<2x64xf32>
    %20 = arith.addf %17, %19 : vector<2x64xf32>
    %21 = arith.negf %20 : vector<2x64xf32>
    %22 = math.exp %21 : vector<2x64xf32>
    %cst_15 = arith.constant 1.000000e+00 : f32
    %23 = vector.broadcast %cst_15 : f32 to vector<2x64xf32>
    %24 = arith.addf %23, %22 : vector<2x64xf32>
    %25 = arith.divf %23, %24 : vector<2x64xf32>
    %26 = vector.extract_strided_slice %25 {offsets = [0, 0], sizes = [2, 32], strides = [1, 1]} : vector<2x64xf32> to vector<2x32xf32>
    %27 = vector.extract_strided_slice %25 {offsets = [0, 32], sizes = [2, 32], strides = [1, 1]} : vector<2x64xf32> to vector<2x32xf32>
    %28 = arith.addf %26, %27 : vector<2x32xf32>
    %29 = tpu.transpose %28, [1, 0] : vector<2x32xf32> -> vector<32x2xf32>
    %c0_16 = arith.constant 0 : index
    %c0_17 = arith.constant 0 : index
    %30 = vector.load %arg9[%c0_16, %c0_17] : memref<32x2xf32, #tpu.memory_space<vmem>>, vector<32x2xf32>
    tpu.vector_store %arg9[%c0_16, %c0_17], %29 {strides = array<i32>} : memref<32x2xf32, #tpu.memory_space<vmem>>, vector<32x2xf32>,
    %c0_18 = arith.constant 0 : index
    %c0_19 = arith.constant 0 : index
    %31 = vector.load %arg6[%c0_18, %c0_19] : memref<32x32xf32, #tpu.memory_space<vmem>>, vector<32x32xf32>
    %c0_20 = arith.constant 0 : index
    %c0_21 = arith.constant 0 : index
    %32 = vector.load %arg7[%c0_20, %c0_21] : memref<32x1xf32, #tpu.memory_space<vmem>>, vector<32x1xf32>
    %c0_i32 = arith.constant 0 : i32
    %33 = arith.index_cast %c0_i32 : i32 to index
    %c0_22 = arith.constant 0 : index
    %c0_23 = arith.constant 0 : index
    %34 = vector.load %arg1[%33, %c0_22, %c0_23] : memref<2x32x256xf32, #tpu.memory_space<vmem>>, vector<1x32x256xf32>
    %35 = vector.shape_cast %34 : vector<1x32x256xf32> to vector<32x256xf32>
    %c0_24 = arith.constant 0 : index
    %36 = arith.index_cast %c0_i32 : i32 to index
    %37 = vector.load %arg9[%c0_24, %36] : memref<32x2xf32, #tpu.memory_space<vmem>>, vector<32x1xf32>
    %38 = arith.mulf %35, %35 : vector<32x256xf32>
    %39 = vector.broadcast %37 : vector<32x1xf32> to vector<32x256xf32>
    %40 = arith.mulf %38, %39 : vector<32x256xf32>
    %cst_25 = arith.constant dense<0.000000e+00> : vector<32x256xf32>
    %41 = tpu.matmul %31, %40, %cst_25 {dimension_numbers = #tpu.dot_dimension_numbers<[1], [0], [0], [1], [0, 0, 1, 1], [], []>} : vector<32x32xf32>, vector<32x256xf32>, vector<32x256xf32> -> vector<32x256xf32>
    %42 = vector.broadcast %32 : vector<32x1xf32> to vector<32x256xf32>
    %43 = arith.addf %41, %42 : vector<32x256xf32>
    %44 = arith.index_cast %c0_i32 : i32 to index
    %c0_26 = arith.constant 0 : index
    %c0_27 = arith.constant 0 : index
    %45 = vector.load %arg8[%44, %c0_26, %c0_27] : memref<2x32x256xf32, #tpu.memory_space<vmem>>, vector<1x32x256xf32>
    %46 = vector.shape_cast %45 : vector<1x32x256xf32> to vector<32x256xf32>
    %47 = vector.shape_cast %43 : vector<32x256xf32> to vector<1x32x256xf32>
    tpu.vector_store %arg8[%44, %c0_26, %c0_27], %47 {strides = array<i32>} : memref<2x32x256xf32, #tpu.memory_space<vmem>>, vector<1x32x256xf32>,
    %c1_i32 = arith.constant 1 : i32
    %48 = arith.index_cast %c1_i32 : i32 to index
    %c0_28 = arith.constant 0 : index
    %c0_29 = arith.constant 0 : index
    %49 = vector.load %arg1[%48, %c0_28, %c0_29] : memref<2x32x256xf32, #tpu.memory_space<vmem>>, vector<1x32x256xf32>
    %50 = vector.shape_cast %49 : vector<1x32x256xf32> to vector<32x256xf32>
    %c0_30 = arith.constant 0 : index
    %51 = arith.index_cast %c1_i32 : i32 to index
    %52 = vector.load %arg9[%c0_30, %51] : memref<32x2xf32, #tpu.memory_space<vmem>>, vector<32x1xf32>
    %53 = arith.mulf %50, %50 : vector<32x256xf32>
    %54 = vector.broadcast %52 : vector<32x1xf32> to vector<32x256xf32>
    %55 = arith.mulf %53, %54 : vector<32x256xf32>
    %cst_31 = arith.constant dense<0.000000e+00> : vector<32x256xf32>
    %56 = tpu.matmul %31, %55, %cst_31 {dimension_numbers = #tpu.dot_dimension_numbers<[1], [0], [0], [1], [0, 0, 1, 1], [], []>} : vector<32x32xf32>, vector<32x256xf32>, vector<32x256xf32> -> vector<32x256xf32>
    %57 = vector.broadcast %32 : vector<32x1xf32> to vector<32x256xf32>
    %58 = arith.addf %56, %57 : vector<32x256xf32>
    %59 = arith.index_cast %c1_i32 : i32 to index
    %c0_32 = arith.constant 0 : index
    %c0_33 = arith.constant 0 : index
    %60 = vector.load %arg8[%59, %c0_32, %c0_33] : memref<2x32x256xf32, #tpu.memory_space<vmem>>, vector<1x32x256xf32>
    %61 = vector.shape_cast %60 : vector<1x32x256xf32> to vector<32x256xf32>
    %62 = vector.shape_cast %58 : vector<32x256xf32> to vector<1x32x256xf32>
    tpu.vector_store %arg8[%59, %c0_32, %c0_33], %62 {strides = array<i32>} : memref<2x32x256xf32, #tpu.memory_space<vmem>>, vector<1x32x256xf32>,
    %c2_i32 = arith.constant 2 : i32
    return
  }
  func.func @transform_0(%arg0: i32) -> (i32, i32, i32) {
    %c0_i32 = arith.constant 0 : i32
    %c0_i32_0 = arith.constant 0 : i32
    %c0_i32_1 = arith.constant 0 : i32
    return %arg0, %c0_i32, %c0_i32_0 : i32, i32, i32
  }
  func.func @transform_1(%arg0: i32) -> (i32, i32) {
    %c0_i32 = arith.constant 0 : i32
    %c0_i32_0 = arith.constant 0 : i32
    %c0_i32_1 = arith.constant 0 : i32
    return %c0_i32, %c0_i32_0 : i32, i32
  }
  func.func @transform_2(%arg0: i32) -> (i32, i32) {
    %c0_i32 = arith.constant 0 : i32
    %c0_i32_0 = arith.constant 0 : i32
    %c0_i32_1 = arith.constant 0 : i32
    return %c0_i32, %c0_i32_0 : i32, i32
  }
  func.func @transform_3(%arg0: i32) -> (i32, i32) {
    %c0_i32 = arith.constant 0 : i32
    %c0_i32_0 = arith.constant 0 : i32
    %c0_i32_1 = arith.constant 0 : i32
    return %c0_i32, %c0_i32_0 : i32, i32
  }
  func.func @transform_4(%arg0: i32) -> (i32, i32) {
    %c0_i32 = arith.constant 0 : i32
    %c0_i32_0 = arith.constant 0 : i32
    %c0_i32_1 = arith.constant 0 : i32
    return %c0_i32, %c0_i32_0 : i32, i32
  }
  func.func @transform_5(%arg0: i32) -> (i32, i32) {
    %c0_i32 = arith.constant 0 : i32
    %c0_i32_0 = arith.constant 0 : i32
    %c0_i32_1 = arith.constant 0 : i32
    return %c0_i32, %c0_i32_0 : i32, i32
  }
  func.func @transform_6(%arg0: i32) -> (i32, i32) {
    %c0_i32 = arith.constant 0 : i32
    %c0_i32_0 = arith.constant 0 : i32
    %c0_i32_1 = arith.constant 0 : i32
    return %c0_i32, %c0_i32_0 : i32, i32
  }
  func.func @transform_7(%arg0: i32) -> (i32, i32, i32) {
    %c0_i32 = arith.constant 0 : i32
    %c0_i32_0 = arith.constant 0 : i32
    %c0_i32_1 = arith.constant 0 : i32
    return %arg0, %c0_i32, %c0_i32_0 : i32, i32, i32
  }
}

</mosaic_0001>

<bundles_post_ra>
// kernel: tpu_custom_call.1
= control target key start
LH: loop header
LB: loop body
LE: loop exit
PB: predicated region body
PF: predicated region fallthrough
CT: control target
= control target key end

     0   :  { %12 = vsyncpa [#allocation4], 0  ;;  %s1139_s0 = inlined_call_operand.hbm [shape: f32[2,32,256], index: 0, kind: input, shape index: {}]   ;;  %s1140_s1 = inlined_call_operand.vmem [shape: f32[32,4], index: 1, kind: input, shape index: {}]   ;;  %s1141_s2 = inlined_call_operand.vmem [shape: f32[1,4], index: 2, kind: input, shape index: {}]   ;;  %s1142_s3 = inlined_call_operand.vmem [shape: f32[6,64], index: 3, kind: input, shape index: {}]   ;;  %s1143_s4 = inlined_call_operand.vmem [shape: f32[1,64], index: 4, kind: input, shape index: {}]   ;;  %s1144_s5 = inlined_call_operand.vmem [shape: f32[32,32], index: 5, kind: input, shape index: {}]   ;;  %s1145_s6 = inlined_call_operand.vmem [shape: f32[32,1], index: 6, kind: input, shape index: {}]   ;;  %s1146_s7 = inlined_call_operand.hbm [shape: f32[2,32,256], index: 7, kind: output, shape index: {}]  }
   0x1   :  { %13 = vsyncpa [#allocation5], 0  ;;  %s898_s24 = smov [#allocation3]  }
   0x2   :  { %s19_s25 = sshll.u32 %s898_s24, 4  ;;  %s20_s25 = int_to_ptr.vmem [resolvable:$true] %s19_s25 }
   0x3   :  { %s862_s26 = scalar_lea.vmem %s20_s25, 2048  ;;  %p867_p1 = scmp.lt.s32.totalorder %s20_s25, %s20_s25 }
   0x4   :  { %p863_p0 = scmp.ne.s32.totalorder %s20_s25, %s862_s26  ;;  %p868_p2 = scmp.lt.s32.totalorder %s862_s26, %s862_s26 }
   0x6   :  { %p869_p3 = por %p868_p2, %p867_p1 }
   0x8   :  { %p870_p4 = pnand %p869_p3, %p863_p0 }
   0xa   :  { %873 = shalt.err (!%p870_p4)
}
   0xb   :  { %s899_s27 = smov 256   ;;  %s900_s28 = smov 16  }
   0xc   :  { %25 = dma.hbm_to_vmem [thread:$0]  %s1139_s0, 2048, %s20_s25, [#allocation4], %s899_s27, %s899_s27, %s900_s28  }
   0xd   :  { %894 = dma.done.wait [#allocation4], 2048  }
   0xe   :  { %895 = vsyncadd [#allocation4], 4294965248  ;;  %v954_v0 = vld [vmem:[#allocation3 + $0x40] sm:$0xff]  ;;  %v956_v1 = vld [vmem:[#allocation3 + $0x48] sm:$0xff]  ;;  %v901_v32 = vmov 0.0   ;;  %vm902_vm0 = vmmov 0   ;;  %v122_v42 = vlaneseq }
   0xf   :  { %v958_v2 = vld [vmem:[#allocation3] sm:$0xff]  ;;  %v69_v3 = vadd.f32 %v956_v1, %v954_v0  ;;  %v962_v4 = vld [vmem:[#allocation3 + $0x8] sm:$0xff]  ;;  %v964_v5 = vld [vmem:[#allocation3 + $0x50] sm:$0xff]  ;;  %v102_v27 = vmax.f32 %v954_v0, %v956_v1  ;;  %819 = vmatprep.subr.mxu0 %v901_v32  ;;  %830 = vmatprep.subr.mxu1 %v901_v32  ;;  %vm133_vm1 = vcmask 130112   ;;  %vm140_vm2 = vcmask 195712   ;;  %s903_s18 = smov 2  }
  0x10   :  { %v966_v6 = vld [vmem:[#allocation3 + $0x58] sm:$0xff]  ;;  %v57_v7 = vadd.f32 %v962_v4, %v958_v2  ;;  %v970_v8 = vld [vmem:[#allocation3 + $0x10] sm:$0xff]  ;;  %v978_v12 = vld [vmem:[#allocation3 + $0x60] sm:$0xff]  ;;  %v90_v25 = vmax.f32 %v958_v2, %v962_v4  ;;  %827 = vmatprep.mubr.msk.f32.mxu0 %vm902_vm0, %v901_v32  ;;  %832 = vmatprep.mubr.msk.f32.mxu1 %vm902_vm0, %v901_v32  ;;  %v123_v45 = vand.u32 127, %v122_v42  ;;  %v125_v47 = vshrl.u32 %v122_v42, 7 }
  0x11   :  { %v972_v9 = vld [vmem:[#allocation3 + $0x18] sm:$0xff]  ;;  %70 = vadd.xlane.f32.xlu1 %v69_v3  ;;  %v72_v10 = vadd.f32 %v966_v6, %v964_v5  ;;  %v980_v13 = vld [vmem:[#allocation3 + $0x68] sm:$0xff]  ;;  %v982_v14 = vld [vmem:[#allocation3 + $0x20] sm:$0xff]  ;;  %v105_v26 = vmax.f32 %v964_v5, %v966_v6  ;;  %vm147_vm3 = vcmask 261312   ;;  %vm168_vm4 = vcmask 1041409  }
  0x12   :  { %58 = vadd.xlane.f32.xlu0 %v57_v7  ;;  %v60_v11 = vadd.f32 %v972_v9, %v970_v8  ;;  %v984_v15 = vld [vmem:[#allocation3 + $0x28] sm:$0xff]  ;;  %v75_v16 = vadd.f32 %v980_v13, %v978_v12  ;;  %v990_v18 = vld [vmem:[#allocation3 + $0x70] sm:$0xff]  ;;  %v992_v19 = vld [vmem:[#allocation3 + $0x78] sm:$0xff]  ;;  %v93_v24 = vmax.f32 %v970_v8, %v972_v9  ;;  %v108_v28 = vmax.f32 %v978_v12, %v980_v13 }
  0x13   :  { %v63_v17 = vadd.f32 %v984_v15, %v982_v14  ;;  %v994_v20 = vld [vmem:[#allocation3 + $0x30] sm:$0xff]  ;;  %v996_v21 = vld [vmem:[#allocation3 + $0x38] sm:$0xff]  ;;  %v78_v22 = vadd.f32 %v992_v19, %v990_v18  ;;  %v96_v29 = vmax.f32 %v982_v14, %v984_v15  ;;  %v111_v30 = vmax.f32 %v990_v18, %v992_v19  ;;  %v223_v35 = vld [vmem:[%s1140_s1 + $0x8] sm:$0xff] }
  0x14   :  { %v66_v23 = vadd.f32 %v996_v21, %v994_v20  ;;  %v99_v31 = vmax.f32 %v994_v20, %v996_v21  ;;  %v225_v33 = vld [vmem:[%s1140_s1 + $0x18] sm:$0xff]  ;;  %v224_v34 = vld [vmem:[%s1140_s1 + $0x10] sm:$0xff]  ;;  %v222_v36 = vld [vmem:[%s1140_s1] sm:$0xff]  ;;  %v128_v48 = vadd.s32 4294967288, %v123_v45  ;;  %v135_v49 = vadd.s32 4294967280, %v123_v45 }
  0x15   :  { %73 = vadd.xlane.f32.xlu1 %v72_v10  ;;  %820 = vmatpush3.msra.mxu0 %v225_v33  ;;  %v142_v51 = vadd.s32 4294967272, %v123_v45  ;;  %v126_v53 = vsub.s32 %v123_v45, %v125_v47  ;;  %vm217_vm5 = vcmask 1043459   ;;  %vm220_vm6 = vcmask 1041408  }
  0x16   :  { %61 = vadd.xlane.f32.xlu0 %v60_v11  ;;  %821 = vmatprep.subr.mxu0 %v901_v32  ;;  %v131_v54 = vsub.s32 %v128_v48, %v125_v47  ;;  %v138_v56 = vsub.s32 %v135_v49, %v125_v47  ;;  %vm233_vm7 = vcmask 261120   ;;  %vm327_vm8 = vcmask 1045504  }
  0x17   :  { %822 = vmatpush3.msra.mxu0 %v224_v34  ;;  %v145_v63 = vsub.s32 %v142_v51, %v125_v47  ;;  %vm313_vm9 = vcmask 31744   ;;  %vm323_vm10 = vcmask 48128   ;;  %vm444_vm11 = vcmask 15360  }
  0x18   :  { %823 = vmatprep.subr.mxu0 %v901_v32 }
  0x19   :  { %76 = vadd.xlane.f32.xlu1 %v75_v16  ;;  %824 = vmatpush3.msra.mxu0 %v223_v35 }
  0x1a   :  { %64 = vadd.xlane.f32.xlu0 %v63_v17  ;;  %825 = vmatprep.subr.mxu0 %v901_v32 }
  0x1b   :  { %826 = vmatpush3.msra.mxu0 %v222_v36 }
  0x1d   :  { %79 = vadd.xlane.f32.xlu1 %v78_v22 }
  0x1e   :  { %67 = vadd.xlane.f32.xlu0 %v66_v23 }
  0x21   :  { %94 = vmax.xlane.f32.xlu1 %v93_v24 }
  0x22   :  { %91 = vmax.xlane.f32.xlu0 %v90_v25 }
  0x25   :  { %106 = vmax.xlane.f32.xlu1 %v105_v26 }
  0x26   :  { %103 = vmax.xlane.f32.xlu0 %v102_v27 }
  0x29   :  { %109 = vmax.xlane.f32.xlu1 %v108_v28 }
  0x2a   :  { %97 = vmax.xlane.f32.xlu0 %v96_v29 }
  0x2d   :  { %112 = vmax.xlane.f32.xlu1 %v111_v30 }
  0x2e   :  { %100 = vmax.xlane.f32.xlu0 %v99_v31 }
  0x9a   :  { %v71_v37 = vpop.xlane.xlu1 %70 }
  0x9b   :  { %v59_v38 = vpop.xlane.xlu0 %58  ;;  %v86_v57 = vmul.f32 0.00390625, %v71_v37 }
  0x9c   :  { %v82_v58 = vmul.f32 0.00390625, %v59_v38 }
  0x9d   :  { %v152_v16 = vrot.slane %v86_v57, %v126_v53 }
  0x9e   :  { %v74_v39 = vpop.xlane.xlu1 %73  ;;  %v127_v17 = vrot.slane %v82_v58, %v126_v53 }
  0x9f   :  { %v62_v40 = vpop.xlane.xlu0 %61  ;;  %v87_v55 = vmul.f32 0.00390625, %v74_v39 }
  0xa0   :  { %v83_v59 = vmul.f32 0.00390625, %v62_v40 }
  0xa1   :  { %v156_v11 = vrot.slane %v87_v55, %v131_v54  ;;  %v315_v55 = vld [vmem:[%s1142_s3] sm:$0x3f] }
  0xa2   :  { %v77_v41 = vpop.xlane.xlu1 %76  ;;  %v132_v22 = vrot.slane %v83_v59, %v131_v54  ;;  %831 = vmatpush3.msk.msra.mxu1 %vm327_vm8, %v315_v55 }
  0xa3   :  { %v65_v43 = vpop.xlane.xlu0 %64  ;;  %v88_v60 = vmul.f32 0.00390625, %v77_v41  ;;  %v157_v35 = vsel %vm133_vm1, %v156_v11, %v152_v16 }
  0xa4   :  { %v84_v62 = vmul.f32 0.00390625, %v65_v43  ;;  %v134_v37 = vsel %vm133_vm1, %v132_v22, %v127_v17 }
  0xa5   :  { %v161_v23 = vrot.slane %v88_v60, %v138_v56 }
  0xa6   :  { %v80_v44 = vpop.xlane.xlu1 %79  ;;  %v139_v25 = vrot.slane %v84_v62, %v138_v56 }
  0xa7   :  { %v68_v46 = vpop.xlane.xlu0 %67  ;;  %v89_v3 = vmul.f32 0.00390625, %v80_v44  ;;  %v162_v38 = vsel %vm140_vm2, %v161_v23, %v157_v35 }
  0xa8   :  { %v85_v10 = vmul.f32 0.00390625, %v68_v46  ;;  %v141_v40 = vsel %vm140_vm2, %v139_v25, %v134_v37  ;;  %v453_v37 = vld [vmem:[%s1145_s6] sm:$0xff] }
  0xa9   :  { %v166_v26 = vrot.slane %v89_v3, %v145_v63  ;;  %v800_v3 = vld [vmem:[%s1143_s4] ss:$0 sm:$0xff] }
  0xaa   :  { %v95_v50 = vpop.xlane.xlu1 %94  ;;  %v146_v30 = vrot.slane %v85_v10, %v145_v63 }
  0xab   :  { %v92_v52 = vpop.xlane.xlu0 %91  ;;  %v186_v31 = vrot.slane %v95_v50, %v131_v54  ;;  %v167_v41 = vsel %vm147_vm3, %v166_v26, %v162_v38  ;;  %v905_v26 = vmov 0   ;;  %v454_v38 = vld [vmem:[%s1145_s6 + $0x8] sm:$0xff] }
  0xac   :  { %v182_v33 = vrot.slane %v92_v52, %v126_v53  ;;  %v148_v45 = vsel %vm147_vm3, %v146_v30, %v141_v40  ;;  %845 = vset.pattern.permute.xlu0 %v905_v26  ;;  %v456_v40 = vld [vmem:[%s1145_s6 + $0x18] sm:$0xff] }
  0xad   :  { %v169_v52 = vsel %vm168_vm4, %v167_v41, %v148_v45  ;;  %v476_v45 = vmul.f32 %v996_v21, %v996_v21  ;;  %v654_v21 = vmul.f32 %v992_v19, %v992_v19 }
  0xae   :  { %v107_v61 = vpop.xlane.xlu1 %106  ;;  %v187_v46 = vsel %vm133_vm1, %v186_v31, %v182_v33 }
  0xaf   :  { %v104_v7 = vpop.xlane.xlu0 %103  ;;  %v205_v27 = vrot.slane %v107_v61, %v131_v54 }
  0xb0   :  { %v201_v28 = vrot.slane %v104_v7, %v126_v53 }
  0xb2   :  { %v110_v24 = vpop.xlane.xlu1 %109  ;;  %v206_v42 = vsel %vm133_vm1, %v205_v27, %v201_v28  ;;  %v906_v27 = vmov 1  }
  0xb3   :  { %v98_v29 = vpop.xlane.xlu0 %97  ;;  %v210_v34 = vrot.slane %v110_v24, %v138_v56 }
  0xb4   :  { %v191_v36 = vrot.slane %v98_v29, %v138_v56  ;;  %v798_v56 = vld [vmem:[%s1141_s2] ss:$0 sm:$0xff]  ;;  %s904_s2 = smov 96  }
  0xb5   :  { %v211_v47 = vsel %vm140_vm2, %v210_v34, %v206_v42 }
  0xb6   :  { %v113_v39 = vpop.xlane.xlu1 %112  ;;  %v192_v49 = vsel %vm140_vm2, %v191_v36, %v187_v46  ;;  %v474_v46 = vmul.f32 %v984_v15, %v984_v15  ;;  %v470_v15 = vmul.f32 %v962_v4, %v962_v4  ;;  %v652_v4 = vmul.f32 %v980_v13, %v980_v13 }
  0xb7   :  { %v215_v43 = vrot.slane %v113_v39, %v145_v63  ;;  %v101_v44 = vpop.xlane.xlu0 %100  ;;  %v455_v39 = vld [vmem:[%s1145_s6 + $0x10] sm:$0xff] }
  0xb8   :  { %v196_v48 = vrot.slane %v101_v44, %v145_v63  ;;  %v475_v44 = vmul.f32 %v994_v20, %v994_v20  ;;  %v653_v20 = vmul.f32 %v990_v18, %v990_v18 }
  0xb9   :  { %v216_v50 = vsel %vm147_vm3, %v215_v43, %v211_v47  ;;  %v473_v47 = vmul.f32 %v982_v14, %v982_v14  ;;  %v469_v14 = vmul.f32 %v958_v2, %v958_v2  ;;  %v650_v2 = vmul.f32 %v966_v6, %v966_v6 }
  0xba   :  { %v197_v51 = vsel %vm147_vm3, %v196_v48, %v192_v49  ;;  %v472_v49 = vmul.f32 %v972_v9, %v972_v9  ;;  %v647_v6 = vmul.f32 %v954_v0, %v954_v0  ;;  %v451_v0 = vld [vmem:[%s1144_s5 + $0x10] sm:$0xff] }
  0xbb   :  { %v218_v53 = vsel %vm217_vm5, %v216_v50, %v197_v51 }
  0xbc   :  { %v221_v54 = vsel %vm220_vm6, %v169_v52, %v218_v53  ;;  %v471_v52 = vmul.f32 %v970_v8, %v970_v8  ;;  %v651_v8 = vmul.f32 %v978_v12, %v978_v12  ;;  %v649_v12 = vmul.f32 %v964_v5, %v964_v5  ;;  %v450_v5 = vld [vmem:[%s1144_s5 + $0x8] sm:$0xff] }
  0xbd   :  { %828 = vmatmul.mubr.msk.f32.vlgmr.msra.gmra.mxu0 %vm233_vm7, %v221_v54 }
  0xbe   :  { %747 = vmatprep.mubr.f32.mxu0 %v901_v32 }
 0x17d   :  { %v303_v57 = vpop.f32.mrf.mxu0 }
 0x17e   :  { %v304_v58 = vadd.f32 %v798_v56, %v303_v57 }
 0x17f   :  { %v829_v59 = vpop.f32.mrf.mxu0 }
 0x180   :  { %v307_v60 = vmax.f32 %v304_v58, 0.0  ;;  %v449_v59 = vld [vmem:[%s1144_s5] sm:$0xff] }
 0x182   :  { %v309_v61 = vrot.slane %v307_v60, 2 }
 0x184   :  { %310 = vrot.lane.b32.xlu0 %v309_v61, %s903_s18 }
 0x1f6   :  { %v311_v62 = vpop.permute.xlu0 %310 }
 0x1f7   :  { %v314_v63 = vsel %vm313_vm9, %v307_v60, %v311_v62 }
 0x1f8   :  { %833 = vmatmul.mubr.msk.f32.vlgmr.msra.gmra.mxu1 %vm323_vm10, %v314_v63  ;;  %v648_v63 = vmul.f32 %v956_v1, %v956_v1  ;;  %v452_v1 = vld [vmem:[%s1144_s5 + $0x18] sm:$0xff]  ;;  %s907_s5 = smov [#allocation6]  }
 0x1f9   :  { %601 = vmatprep.mubr.f32.mxu1 %v901_v32  ;;  %s786_s12 = sshll.u32 %s907_s5, 4  ;;  %s787_s12 = int_to_ptr.vmem [resolvable:$true] %s786_s12 }
 0x1fa   :  { %s874_s13 = scalar_lea.vmem %s787_s12, 2048  ;;  %p879_p6 = scmp.lt.s32.totalorder %s787_s12, %s787_s12 }
 0x1fb   :  { %p875_p5 = scmp.ne.s32.totalorder %s787_s12, %s874_s13  ;;  %p880_p7 = scmp.lt.s32.totalorder %s874_s13, %s874_s13 }
 0x1fd   :  { %p881_p8 = por %p880_p7, %p879_p6 }
 0x1ff   :  { %p882_p9 = pnand %p881_p8, %p875_p5 }
 0x2b8   :  { %v397_v7 = vpop.f32.mrf.mxu1 }
 0x2b9   :  { %v398_v10 = vadd.f32 %v800_v3, %v397_v7 }
 0x2ba   :  { %v834_v11 = vpop.f32.mrf.mxu1 }
 0x2bb   :  { %v803_v16 = vmul.f32 -1.442695, %v398_v10 }
 0x2bd   :  { %850 = vpow2.f32 %v803_v16 }
 0x2ca   :  { %v851_v17 = vpop.eup %850 }
 0x2cb   :  { %v404_v22 = vadd.f32 1.0, %v851_v17 }
 0x2cd   :  { %852 = vrcp.f32 %v404_v22 }
 0x2da   :  { %v853_v23 = vpop.eup %852 }
 0x2db   :  { %408 = vrot.lane.b32.xlu1 %v853_v23, %s904_s2 }
 0x34d   :  { %v409_v24 = vpop.permute.xlu1 %408 }
 0x34e   :  { %v411_v25 = vadd.f32 %v853_v23, %v409_v24 }
 0x350   :  { %412 = vxpose.xlu1.b32.start.end [1/1] (short) (narrow) %v411_v25, 32 }
 0x36e   :  { %846 = vset.pattern.permute.xlu1 %v906_v27 }
 0x3cc   :  { %v428_v28 = vpop.trf.xlu1 }
 0x3cd   :  { %445 = vst.msk [vmem:[#allocation2] sm:$0xff] %vm444_vm11, %v428_v28 }
 0x3d0   :  { %v429_v29 = vpop.trf.xlu1 }
 0x3d1   :  { %446 = vst.msk [vmem:[#allocation2 + $0x8] sm:$0xff] %vm444_vm11, %v429_v29 }
 0x3d4   :  { %v430_v30 = vpop.trf.xlu1  ;;  %v465_v34 = vld [vmem:[#allocation2] sm:$0xff] }
 0x3d5   :  { %447 = vst.msk [vmem:[#allocation2 + $0x10] sm:$0xff] %vm444_vm11, %v430_v30 }
 0x3d8   :  { %v644_v31 = vld [vmem:[#allocation2 + $0x8] sm:$0xff]  ;;  %v431_v33 = vpop.trf.xlu1 }
 0x3d9   :  { %662 = vperm.xlu1 %846, %v644_v31   ;;  %484 = vperm.xlu0 %845, %v644_v31   ;;  %448 = vst.msk [vmem:[#allocation2 + $0x18] sm:$0xff] %vm444_vm11, %v431_v33 }
 0x3dc   :  { %v467_v35 = vld [vmem:[#allocation2 + $0x10] sm:$0xff] }
 0x3dd   :  { %479 = vperm.xlu0 %845, %v465_v34  }
 0x3e0   :  { %v468_v36 = vld [vmem:[#allocation2 + $0x18] sm:$0xff] }
 0x3e1   :  { %489 = vperm.xlu0 %845, %v467_v35  }
 0x3e5   :  { %494 = vperm.xlu0 %845, %v468_v36  }
 0x3e9   :  { %847 = vset.pattern.permute.xlu0 %v906_v27 }
 0x3ea   :  { %672 = vperm.xlu0 %847, %v468_v36  }
 0x3ee   :  { %667 = vperm.xlu0 %847, %v467_v35  }
 0x3f2   :  { %657 = vperm.xlu0 %847, %v465_v34  }
 0x3f6   :  { %848 = vset.pattern.permute.xlu0 %v905_v26 }
 0x3f7   :  { %507 = vperm.xlu0 %848, %v453_v37  }
 0x3fb   :  { %512 = vperm.xlu0 %848, %v454_v38  }
 0x3ff   :  { %517 = vperm.xlu0 %848, %v455_v39  }
 0x403   :  { %522 = vperm.xlu0 %848, %v456_v40  }
 0x407   :  { %849 = vset.pattern.permute.xlu0 %v906_v27 }
 0x454   :  { %v485_v41 = vpop.permute.xlu0 %484  ;;  %v663_v60 = vpop.permute.xlu1 %662 }
 0x455   :  { %v500_v54 = vmul.f32 %v485_v41, %v472_v49  ;;  %v499_v18 = vmul.f32 %v485_v41, %v471_v52  ;;  %v678_v3 = vmul.f32 %v663_v60, %v650_v2  ;;  %v677_v7 = vmul.f32 %v663_v60, %v649_v12 }
 0x458   :  { %v480_v42 = vpop.permute.xlu0 %479 }
 0x459   :  { %v498_v19 = vmul.f32 %v480_v42, %v470_v15  ;;  %v497_v58 = vmul.f32 %v480_v42, %v469_v14 }
 0x45c   :  { %v490_v43 = vpop.permute.xlu0 %489 }
 0x45d   :  { %v502_v53 = vmul.f32 %v490_v43, %v474_v46  ;;  %v501_v9 = vmul.f32 %v490_v43, %v473_v47 }
 0x460   :  { %v495_v48 = vpop.permute.xlu0 %494 }
 0x461   :  { %v503_v50 = vmul.f32 %v495_v48, %v475_v44  ;;  %v504_v51 = vmul.f32 %v495_v48, %v476_v45 }
 0x463   :  { %561 = vmatprep.subr.mxu1 %v504_v51 }
 0x464   :  { %562 = vmatpush1.msra.mxu1 %v503_v50 }
 0x465   :  { %563 = vmatprep.subr.mxu1 %v502_v53  ;;  %v673_v55 = vpop.permute.xlu0 %672 }
 0x466   :  { %v681_v56 = vmul.f32 %v673_v55, %v653_v20  ;;  %v682_v57 = vmul.f32 %v673_v55, %v654_v21  ;;  %564 = vmatpush1.msra.mxu1 %v501_v9 }
 0x467   :  { %565 = vmatprep.subr.mxu1 %v500_v54 }
 0x468   :  { %566 = vmatpush1.msra.mxu1 %v499_v18  ;;  %707 = vmatprep.subr.mxu0 %v682_v57 }
 0x469   :  { %567 = vmatprep.subr.mxu1 %v498_v19  ;;  %708 = vmatpush1.msra.mxu0 %v681_v56  ;;  %v668_v61 = vpop.permute.xlu0 %667 }
 0x46a   :  { %v679_v13 = vmul.f32 %v668_v61, %v651_v8  ;;  %v680_v62 = vmul.f32 %v668_v61, %v652_v4  ;;  %568 = vmatpush1.msra.mxu1 %v497_v58 }
 0x46b   :  { %804 = vmatmul.mubr.msk.f32.vlgmr.msra.gmra.mxu1 %vm233_vm7, %v449_v59 }
 0x46c   :  { %709 = vmatprep.subr.mxu0 %v680_v62  ;;  %607 = vmatprep.mubr.f32.mxu1 %v901_v32 }
 0x46d   :  { %710 = vmatpush1.msra.mxu0 %v679_v13  ;;  %v658_v10 = vpop.permute.xlu0 %657 }
 0x46e   :  { %v675_v11 = vmul.f32 %v658_v10, %v647_v6  ;;  %v676_v16 = vmul.f32 %v658_v10, %v648_v63  ;;  %711 = vmatprep.subr.mxu0 %v678_v3 }
 0x46f   :  { %805 = vmatmul.mubr.msk.f32.gmra.mxu1 %vm233_vm7, %v450_v5  ;;  %712 = vmatpush1.msra.mxu0 %v677_v7 }
 0x470   :  { %713 = vmatprep.subr.mxu0 %v676_v16  ;;  %613 = vmatprep.mubr.f32.mxu1 %v901_v32 }
 0x471   :  { %714 = vmatpush1.msra.mxu0 %v675_v11 }
 0x472   :  { %808 = vmatmul.mubr.msk.f32.vlgmr.msra.gmra.mxu0 %vm233_vm7, %v449_v59  ;;  %v508_v17 = vpop.permute.xlu0 %507 }
 0x473   :  { %806 = vmatmul.mubr.msk.f32.gmra.mxu1 %vm233_vm7, %v451_v0  ;;  %753 = vmatprep.mubr.f32.mxu0 %v901_v32 }
 0x474   :  { %619 = vmatprep.mubr.f32.mxu1 %v901_v32 }
 0x476   :  { %809 = vmatmul.mubr.msk.f32.gmra.mxu0 %vm233_vm7, %v450_v5  ;;  %v513_v23 = vpop.permute.xlu0 %512 }
 0x477   :  { %807 = vmatmul.mubr.msk.f32.gmra.mxu1 %vm233_vm7, %v452_v1  ;;  %759 = vmatprep.mubr.f32.mxu0 %v901_v32 }
 0x47a   :  { %810 = vmatmul.mubr.msk.f32.gmra.mxu0 %vm233_vm7, %v451_v0  ;;  %v518_v29 = vpop.permute.xlu0 %517 }
 0x47b   :  { %765 = vmatprep.mubr.f32.mxu0 %v901_v32 }
 0x47e   :  { %811 = vmatmul.mubr.msk.f32.gmra.mxu0 %vm233_vm7, %v452_v1  ;;  %v523_v41 = vpop.permute.xlu0 %522 }
 0x52b   :  { %v603_v22 = vpop.f32.mrf.mxu1 }
 0x52c   :  { %v604_v24 = vadd.f32 %v603_v22, %v508_v17 }
 0x52d   :  { %v605_v25 = vpop.f32.mrf.mxu1 }
 0x52e   :  { %626 = vst [vmem:[#allocation6] sm:$0xff] %v604_v24  ;;  %v606_v26 = vadd.f32 %v605_v25, %v508_v17 }
 0x52f   :  { %v609_v27 = vpop.f32.mrf.mxu1 }
 0x530   :  { %627 = vst [vmem:[#allocation6 + $0x8] sm:$0xff] %v606_v26  ;;  %v610_v28 = vadd.f32 %v609_v27, %v513_v23 }
 0x531   :  { %v611_v30 = vpop.f32.mrf.mxu1 }
 0x532   :  { %628 = vst [vmem:[#allocation6 + $0x10] sm:$0xff] %v610_v28  ;;  %v612_v31 = vadd.f32 %v611_v30, %v513_v23  ;;  %v749_v33 = vpop.f32.mrf.mxu0 }
 0x533   :  { %v750_v34 = vadd.f32 %v749_v33, %v508_v17  ;;  %v615_v35 = vpop.f32.mrf.mxu1 }
 0x534   :  { %629 = vst [vmem:[#allocation6 + $0x18] sm:$0xff] %v612_v31  ;;  %v616_v32 = vadd.f32 %v615_v35, %v518_v29  ;;  %v751_v36 = vpop.f32.mrf.mxu0 }
 0x535   :  { %773 = vst [vmem:[#allocation6 + $0x40] sm:$0xff] %v750_v34  ;;  %v752_v37 = vadd.f32 %v751_v36, %v508_v17  ;;  %v617_v38 = vpop.f32.mrf.mxu1 }
 0x536   :  { %630 = vst [vmem:[#allocation6 + $0x20] sm:$0xff] %v616_v32  ;;  %v618_v39 = vadd.f32 %v617_v38, %v518_v29  ;;  %v755_v40 = vpop.f32.mrf.mxu0 }
 0x537   :  { %774 = vst [vmem:[#allocation6 + $0x48] sm:$0xff] %v752_v37  ;;  %v756_v42 = vadd.f32 %v755_v40, %v513_v23  ;;  %v621_v43 = vpop.f32.mrf.mxu1 }
 0x538   :  { %631 = vst [vmem:[#allocation6 + $0x28] sm:$0xff] %v618_v39  ;;  %v622_v44 = vadd.f32 %v621_v43, %v523_v41  ;;  %v757_v45 = vpop.f32.mrf.mxu0 }
 0x539   :  { %775 = vst [vmem:[#allocation6 + $0x50] sm:$0xff] %v756_v42  ;;  %v758_v46 = vadd.f32 %v757_v45, %v513_v23  ;;  %v623_v47 = vpop.f32.mrf.mxu1 }
 0x53a   :  { %632 = vst [vmem:[#allocation6 + $0x30] sm:$0xff] %v622_v44  ;;  %v624_v48 = vadd.f32 %v623_v47, %v523_v41  ;;  %v761_v49 = vpop.f32.mrf.mxu0 }
 0x53b   :  { %776 = vst [vmem:[#allocation6 + $0x58] sm:$0xff] %v758_v46  ;;  %v762_v50 = vadd.f32 %v761_v49, %v518_v29 }
 0x53c   :  { %633 = vst [vmem:[#allocation6 + $0x38] sm:$0xff] %v624_v48  ;;  %v763_v51 = vpop.f32.mrf.mxu0 }
 0x53d   :  { %777 = vst [vmem:[#allocation6 + $0x60] sm:$0xff] %v762_v50  ;;  %v764_v52 = vadd.f32 %v763_v51, %v518_v29 }
 0x53e   :  { %v767_v20 = vpop.f32.mrf.mxu0 }
 0x53f   :  { %778 = vst [vmem:[#allocation6 + $0x68] sm:$0xff] %v764_v52  ;;  %v768_v21 = vadd.f32 %v767_v20, %v523_v41 }
 0x540   :  { %v769_v15 = vpop.f32.mrf.mxu0 }
 0x541   :  { %779 = vst [vmem:[#allocation6 + $0x70] sm:$0xff] %v768_v21  ;;  %v770_v53 = vadd.f32 %v769_v15, %v523_v41 }
 0x543   :  { %780 = vst [vmem:[#allocation6 + $0x78] sm:$0xff] %v770_v53 }
 0x544   :  { %885 = shalt.err (!%p882_p9)
}
 0x545   :  { %792 = dma.vmem_to_hbm [thread:$0]  %s787_s12, 2048, %s1146_s7, [#allocation5], %s899_s27, %s899_s27, %s900_s28  }
 0x546   :  { %896 = dma.done.wait [#allocation5], 2048  }
 0x547   :  { %897 = vsyncadd [#allocation5], 4294965248 }
 0x548   :  { %796 = vsyncpa [#allocation4], 1 }
 0x549   :  { %797 = vsyncpa [#allocation5], 1 }

</bundles_post_ra>
